<compile_context>
chip_gen: v7x
topology: tpu7x:2x2x1
jax: 0.10.0
libtpu: 0.0.40
codegen_flags: <defaults>
</compile_context>

<pallas_src>
import jax
import jax.numpy as jnp
from jax.experimental import pallas as pl
from jax.experimental.pallas import tpu as pltpu

LANE = 128   # vreg lane width
SUB = 8      # vreg sublane count (f32)


def conv1x1_relu_kernel(w_ref, x_ref, o_ref):
    # w_ref: (Cout, Cin) f32 in SMEM -> scalar reads.
    # x_ref: (1, Cin, S_TILE, 128) f32 in VMEM, sublane+lane dense per channel.
    # o_ref: (1, Cout, S_TILE, 128) f32 in VMEM.
    cin = x_ref.shape[1]
    cout = o_ref.shape[1]
    st = x_ref.shape[2]
    lane = x_ref.shape[3]

    # Hoist the Cout*Cin scalar->vector weight splats out of the spatial loop.
    w_vec = [
        [jnp.full((SUB, lane), w_ref[o, c], dtype=x_ref.dtype) for c in range(cin)]
        for o in range(cout)
    ]

    n_chunks = st // SUB  # wrapper guarantees st % 8 == 0

    # Chunked spatial loop: per iteration only Cin input vregs + 1 accumulator
    # vreg are live (plus the hoisted splats), so the unrolled Cout x Cin FMA
    # never spills regardless of how large the VMEM tile is.
    @pl.loop(0, n_chunks)
    def _(i):
        r = pl.multiple_of(i * SUB, SUB)
        xs = [x_ref[0, c, pl.ds(r, SUB), :] for c in range(cin)]
        for o in range(cout):
            acc = xs[0] * w_vec[o][0]
            for c in range(1, cin):
                acc = acc + xs[c] * w_vec[o][c]
            o_ref[0, o, pl.ds(r, SUB), :] = jnp.maximum(acc, 0.0)


def conv1x1_relu(x_nchw, weight, *, s_tile=512):
    """x_nchw: [B, Cin, H, W] f32; weight: [Cout, Cin] or [Cout, Cin, 1, 1]."""
    B, Cin, H, W = x_nchw.shape
    weight = weight.reshape(weight.shape[0], Cin)
    Cout = weight.shape[0]
    HW = H * W

    # Lane- and sublane-dense layout: view HW as (S, 128) rows of 128 lanes.
    # Pad so S is sublane-aligned and divides evenly into spatial tiles.
    assert s_tile % SUB == 0
    S = pl.cdiv(HW, LANE)
    S = pl.cdiv(S, SUB) * SUB          # sublane-align
    st = min(s_tile, S)                # spatial tile: rows of 128 lanes, % 8 == 0
    S = pl.cdiv(S, st) * st            # tile-align
    n_s = S // st
    total = S * LANE

    x_flat = x_nchw.reshape(B, Cin, HW)
    if total != HW:
        x_flat = jnp.pad(x_flat, ((0, 0), (0, 0), (0, total - HW)))
    x4 = x_flat.reshape(B, Cin, S, LANE)

    out4 = pl.pallas_call(
        conv1x1_relu_kernel,
        out_shape=jax.ShapeDtypeStruct((B, Cout, S, LANE), x_nchw.dtype),
        grid_spec=pltpu.PrefetchScalarGridSpec(
            num_scalar_prefetch=0,
            grid=(B, n_s),
            in_specs=[
                # 6x3 weight -> SMEM, read scalarly in-kernel.
                pl.BlockSpec(memory_space=pltpu.MemorySpace.SMEM),
                # One (Cin, S_TILE, 128) dense spatial tile per step.
                pl.BlockSpec((1, Cin, st, LANE), lambda b, s: (b, 0, s, 0)),
            ],
            out_specs=pl.BlockSpec((1, Cout, st, LANE), lambda b, s: (b, 0, s, 0)),
        ),
        compiler_params=pltpu.CompilerParams(
            # Both axes are independent: batches and spatial tiles can split
            # across TensorCores (matters on v7x with 2 TCs/chip).
            dimension_semantics=("parallel", "parallel"),
        ),
    )(weight, x4)

    # (B, Cout, S, 128) -> flat -> drop spatial padding -> NCHW.
    out = out4.reshape(B, Cout, total)[:, :, :HW].reshape(B, Cout, H, W)
    return out


if __name__ == "__main__":
    key = jax.random.PRNGKey(0)
    k_x, k_w = jax.random.split(key)

    B, Cin, H, W = 2, 3, 16, 16
    Cout = 6

    x = jax.random.normal(k_x, (B, Cin, H, W), dtype=jnp.float32)
    # PyTorch Conv2d(3, 6, 1, bias=False) weight layout: (Cout, Cin, 1, 1).
    weight = jax.random.normal(k_w, (Cout, Cin, 1, 1), dtype=jnp.float32) * 0.1

    out = conv1x1_relu(x, weight)
    out = jax.block_until_ready(out)

    # Reference: plain-JAX 1x1 conv + ReLU.
    ref = jnp.maximum(jnp.einsum("bchw,oc->bohw", x, weight.reshape(Cout, Cin)), 0.0)
    assert out.shape == (B, Cout, H, W)
    assert jnp.allclose(out, ref, atol=1e-5, rtol=1e-5)

    print("KERNEL_OK")
</pallas_src>

<mosaic_0001>
module attributes {stable_mosaic.version = 11 : i64} {
  func.func @conv1x1_relu_kernel(%arg0: i32, %arg1: i32, %arg2: memref<6x3xf32, #tpu.memory_space<smem>>, %arg3: memref<1x3x8x128xf32, #tpu.memory_space<vmem>>, %arg4: memref<1x6x8x128xf32, #tpu.memory_space<vmem>>) attributes {dimension_semantics = [#tpu.dimension_semantics<parallel>, #tpu.dimension_semantics<parallel>], iteration_bounds = array<i64: 2, 1>, scalar_prefetch = 0 : i64, scratch_operands = 0 : i64, tpu.core_type = #tpu.core_type<tc>, window_params = [{transform_indices = @transform_0, window_bounds = array<i64: 6, 3>}, {transform_indices = @transform_1, window_bounds = array<i64: 1, 3, 8, 128>}, {transform_indices = @transform_2, window_bounds = array<i64: 1, 6, 8, 128>}]} {
    %c0 = arith.constant 0 : index
    %c0_0 = arith.constant 0 : index
    %0 = memref.load %arg2[%c0, %c0_0] : memref<6x3xf32, #tpu.memory_space<smem>>
    %1 = vector.broadcast %0 : f32 to vector<8x128xf32>
    %c0_1 = arith.constant 0 : index
    %c1 = arith.constant 1 : index
    %2 = memref.load %arg2[%c0_1, %c1] : memref<6x3xf32, #tpu.memory_space<smem>>
    %3 = vector.broadcast %2 : f32 to vector<8x128xf32>
    %c0_2 = arith.constant 0 : index
    %c2 = arith.constant 2 : index
    %4 = memref.load %arg2[%c0_2, %c2] : memref<6x3xf32, #tpu.memory_space<smem>>
    %5 = vector.broadcast %4 : f32 to vector<8x128xf32>
    %c1_3 = arith.constant 1 : index
    %c0_4 = arith.constant 0 : index
    %6 = memref.load %arg2[%c1_3, %c0_4] : memref<6x3xf32, #tpu.memory_space<smem>>
    %7 = vector.broadcast %6 : f32 to vector<8x128xf32>
    %c1_5 = arith.constant 1 : index
    %c1_6 = arith.constant 1 : index
    %8 = memref.load %arg2[%c1_5, %c1_6] : memref<6x3xf32, #tpu.memory_space<smem>>
    %9 = vector.broadcast %8 : f32 to vector<8x128xf32>
    %c1_7 = arith.constant 1 : index
    %c2_8 = arith.constant 2 : index
    %10 = memref.load %arg2[%c1_7, %c2_8] : memref<6x3xf32, #tpu.memory_space<smem>>
    %11 = vector.broadcast %10 : f32 to vector<8x128xf32>
    %c2_9 = arith.constant 2 : index
    %c0_10 = arith.constant 0 : index
    %12 = memref.load %arg2[%c2_9, %c0_10] : memref<6x3xf32, #tpu.memory_space<smem>>
    %13 = vector.broadcast %12 : f32 to vector<8x128xf32>
    %c2_11 = arith.constant 2 : index
    %c1_12 = arith.constant 1 : index
    %14 = memref.load %arg2[%c2_11, %c1_12] : memref<6x3xf32, #tpu.memory_space<smem>>
    %15 = vector.broadcast %14 : f32 to vector<8x128xf32>
    %c2_13 = arith.constant 2 : index
    %c2_14 = arith.constant 2 : index
    %16 = memref.load %arg2[%c2_13, %c2_14] : memref<6x3xf32, #tpu.memory_space<smem>>
    %17 = vector.broadcast %16 : f32 to vector<8x128xf32>
    %c3 = arith.constant 3 : index
    %c0_15 = arith.constant 0 : index
    %18 = memref.load %arg2[%c3, %c0_15] : memref<6x3xf32, #tpu.memory_space<smem>>
    %19 = vector.broadcast %18 : f32 to vector<8x128xf32>
    %c3_16 = arith.constant 3 : index
    %c1_17 = arith.constant 1 : index
    %20 = memref.load %arg2[%c3_16, %c1_17] : memref<6x3xf32, #tpu.memory_space<smem>>
    %21 = vector.broadcast %20 : f32 to vector<8x128xf32>
    %c3_18 = arith.constant 3 : index
    %c2_19 = arith.constant 2 : index
    %22 = memref.load %arg2[%c3_18, %c2_19] : memref<6x3xf32, #tpu.memory_space<smem>>
    %23 = vector.broadcast %22 : f32 to vector<8x128xf32>
    %c4 = arith.constant 4 : index
    %c0_20 = arith.constant 0 : index
    %24 = memref.load %arg2[%c4, %c0_20] : memref<6x3xf32, #tpu.memory_space<smem>>
    %25 = vector.broadcast %24 : f32 to vector<8x128xf32>
    %c4_21 = arith.constant 4 : index
    %c1_22 = arith.constant 1 : index
    %26 = memref.load %arg2[%c4_21, %c1_22] : memref<6x3xf32, #tpu.memory_space<smem>>
    %27 = vector.broadcast %26 : f32 to vector<8x128xf32>
    %c4_23 = arith.constant 4 : index
    %c2_24 = arith.constant 2 : index
    %28 = memref.load %arg2[%c4_23, %c2_24] : memref<6x3xf32, #tpu.memory_space<smem>>
    %29 = vector.broadcast %28 : f32 to vector<8x128xf32>
    %c5 = arith.constant 5 : index
    %c0_25 = arith.constant 0 : index
    %30 = memref.load %arg2[%c5, %c0_25] : memref<6x3xf32, #tpu.memory_space<smem>>
    %31 = vector.broadcast %30 : f32 to vector<8x128xf32>
    %c5_26 = arith.constant 5 : index
    %c1_27 = arith.constant 1 : index
    %32 = memref.load %arg2[%c5_26, %c1_27] : memref<6x3xf32, #tpu.memory_space<smem>>
    %33 = vector.broadcast %32 : f32 to vector<8x128xf32>
    %c5_28 = arith.constant 5 : index
    %c2_29 = arith.constant 2 : index
    %34 = memref.load %arg2[%c5_28, %c2_29] : memref<6x3xf32, #tpu.memory_space<smem>>
    %35 = vector.broadcast %34 : f32 to vector<8x128xf32>
    %c0_i32 = arith.constant 0 : i32
    %c1_i32 = arith.constant 1 : i32
    %36 = arith.muli %c0_i32, %c1_i32 : i32
    %c0_i32_30 = arith.constant 0 : i32
    %37 = arith.addi %c0_i32_30, %36 : i32
    %c8_i32 = arith.constant 8 : i32
    %38 = arith.muli %37, %c8_i32 : i32
    %39 = tpu.assume_multiple %38, 8 : i32
    %c0_31 = arith.constant 0 : index
    %c0_32 = arith.constant 0 : index
    %40 = arith.index_cast %39 : i32 to index
    %c0_33 = arith.constant 0 : index
    %41 = vector.load %arg3[%c0_31, %c0_32, %40, %c0_33] : memref<1x3x8x128xf32, #tpu.memory_space<vmem>>, vector<1x1x8x128xf32>
    %42 = vector.shape_cast %41 : vector<1x1x8x128xf32> to vector<8x128xf32>
    %c0_34 = arith.constant 0 : index
    %c1_35 = arith.constant 1 : index
    %43 = arith.index_cast %39 : i32 to index
    %c0_36 = arith.constant 0 : index
    %44 = vector.load %arg3[%c0_34, %c1_35, %43, %c0_36] : memref<1x3x8x128xf32, #tpu.memory_space<vmem>>, vector<1x1x8x128xf32>
    %45 = vector.shape_cast %44 : vector<1x1x8x128xf32> to vector<8x128xf32>
    %c0_37 = arith.constant 0 : index
    %c2_38 = arith.constant 2 : index
    %46 = arith.index_cast %39 : i32 to index
    %c0_39 = arith.constant 0 : index
    %47 = vector.load %arg3[%c0_37, %c2_38, %46, %c0_39] : memref<1x3x8x128xf32, #tpu.memory_space<vmem>>, vector<1x1x8x128xf32>
    %48 = vector.shape_cast %47 : vector<1x1x8x128xf32> to vector<8x128xf32>
    %49 = arith.mulf %42, %1 : vector<8x128xf32>
    %50 = arith.mulf %45, %3 : vector<8x128xf32>
    %51 = arith.addf %49, %50 : vector<8x128xf32>
    %52 = arith.mulf %48, %5 : vector<8x128xf32>
    %53 = arith.addf %51, %52 : vector<8x128xf32>
    %cst = arith.constant 0.000000e+00 : f32
    %54 = vector.broadcast %cst : f32 to vector<8x128xf32>
    %55 = arith.maximumf %53, %54 : vector<8x128xf32>
    %c0_40 = arith.constant 0 : index
    %c0_41 = arith.constant 0 : index
    %56 = arith.index_cast %39 : i32 to index
    %c0_42 = arith.constant 0 : index
    %57 = vector.load %arg4[%c0_40, %c0_41, %56, %c0_42] : memref<1x6x8x128xf32, #tpu.memory_space<vmem>>, vector<1x1x8x128xf32>
    %58 = vector.shape_cast %57 : vector<1x1x8x128xf32> to vector<8x128xf32>
    %59 = vector.shape_cast %55 : vector<8x128xf32> to vector<1x1x8x128xf32>
    tpu.vector_store %arg4[%c0_40, %c0_41, %56, %c0_42], %59 {strides = array<i32>} : memref<1x6x8x128xf32, #tpu.memory_space<vmem>>, vector<1x1x8x128xf32>,
    %60 = arith.mulf %42, %7 : vector<8x128xf32>
    %61 = arith.mulf %45, %9 : vector<8x128xf32>
    %62 = arith.addf %60, %61 : vector<8x128xf32>
    %63 = arith.mulf %48, %11 : vector<8x128xf32>
    %64 = arith.addf %62, %63 : vector<8x128xf32>
    %cst_43 = arith.constant 0.000000e+00 : f32
    %65 = vector.broadcast %cst_43 : f32 to vector<8x128xf32>
    %66 = arith.maximumf %64, %65 : vector<8x128xf32>
    %c0_44 = arith.constant 0 : index
    %c1_45 = arith.constant 1 : index
    %67 = arith.index_cast %39 : i32 to index
    %c0_46 = arith.constant 0 : index
    %68 = vector.load %arg4[%c0_44, %c1_45, %67, %c0_46] : memref<1x6x8x128xf32, #tpu.memory_space<vmem>>, vector<1x1x8x128xf32>
    %69 = vector.shape_cast %68 : vector<1x1x8x128xf32> to vector<8x128xf32>
    %70 = vector.shape_cast %66 : vector<8x128xf32> to vector<1x1x8x128xf32>
    tpu.vector_store %arg4[%c0_44, %c1_45, %67, %c0_46], %70 {strides = array<i32>} : memref<1x6x8x128xf32, #tpu.memory_space<vmem>>, vector<1x1x8x128xf32>,
    %71 = arith.mulf %42, %13 : vector<8x128xf32>
    %72 = arith.mulf %45, %15 : vector<8x128xf32>
    %73 = arith.addf %71, %72 : vector<8x128xf32>
    %74 = arith.mulf %48, %17 : vector<8x128xf32>
    %75 = arith.addf %73, %74 : vector<8x128xf32>
    %cst_47 = arith.constant 0.000000e+00 : f32
    %76 = vector.broadcast %cst_47 : f32 to vector<8x128xf32>
    %77 = arith.maximumf %75, %76 : vector<8x128xf32>
    %c0_48 = arith.constant 0 : index
    %c2_49 = arith.constant 2 : index
    %78 = arith.index_cast %39 : i32 to index
    %c0_50 = arith.constant 0 : index
    %79 = vector.load %arg4[%c0_48, %c2_49, %78, %c0_50] : memref<1x6x8x128xf32, #tpu.memory_space<vmem>>, vector<1x1x8x128xf32>
    %80 = vector.shape_cast %79 : vector<1x1x8x128xf32> to vector<8x128xf32>
    %81 = vector.shape_cast %77 : vector<8x128xf32> to vector<1x1x8x128xf32>
    tpu.vector_store %arg4[%c0_48, %c2_49, %78, %c0_50], %81 {strides = array<i32>} : memref<1x6x8x128xf32, #tpu.memory_space<vmem>>, vector<1x1x8x128xf32>,
    %82 = arith.mulf %42, %19 : vector<8x128xf32>
    %83 = arith.mulf %45, %21 : vector<8x128xf32>
    %84 = arith.addf %82, %83 : vector<8x128xf32>
    %85 = arith.mulf %48, %23 : vector<8x128xf32>
    %86 = arith.addf %84, %85 : vector<8x128xf32>
    %cst_51 = arith.constant 0.000000e+00 : f32
    %87 = vector.broadcast %cst_51 : f32 to vector<8x128xf32>
    %88 = arith.maximumf %86, %87 : vector<8x128xf32>
    %c0_52 = arith.constant 0 : index
    %c3_53 = arith.constant 3 : index
    %89 = arith.index_cast %39 : i32 to index
    %c0_54 = arith.constant 0 : index
    %90 = vector.load %arg4[%c0_52, %c3_53, %89, %c0_54] : memref<1x6x8x128xf32, #tpu.memory_space<vmem>>, vector<1x1x8x128xf32>
    %91 = vector.shape_cast %90 : vector<1x1x8x128xf32> to vector<8x128xf32>
    %92 = vector.shape_cast %88 : vector<8x128xf32> to vector<1x1x8x128xf32>
    tpu.vector_store %arg4[%c0_52, %c3_53, %89, %c0_54], %92 {strides = array<i32>} : memref<1x6x8x128xf32, #tpu.memory_space<vmem>>, vector<1x1x8x128xf32>,
    %93 = arith.mulf %42, %25 : vector<8x128xf32>
    %94 = arith.mulf %45, %27 : vector<8x128xf32>
    %95 = arith.addf %93, %94 : vector<8x128xf32>
    %96 = arith.mulf %48, %29 : vector<8x128xf32>
    %97 = arith.addf %95, %96 : vector<8x128xf32>
    %cst_55 = arith.constant 0.000000e+00 : f32
    %98 = vector.broadcast %cst_55 : f32 to vector<8x128xf32>
    %99 = arith.maximumf %97, %98 : vector<8x128xf32>
    %c0_56 = arith.constant 0 : index
    %c4_57 = arith.constant 4 : index
    %100 = arith.index_cast %39 : i32 to index
    %c0_58 = arith.constant 0 : index
    %101 = vector.load %arg4[%c0_56, %c4_57, %100, %c0_58] : memref<1x6x8x128xf32, #tpu.memory_space<vmem>>, vector<1x1x8x128xf32>
    %102 = vector.shape_cast %101 : vector<1x1x8x128xf32> to vector<8x128xf32>
    %103 = vector.shape_cast %99 : vector<8x128xf32> to vector<1x1x8x128xf32>
    tpu.vector_store %arg4[%c0_56, %c4_57, %100, %c0_58], %103 {strides = array<i32>} : memref<1x6x8x128xf32, #tpu.memory_space<vmem>>, vector<1x1x8x128xf32>,
    %104 = arith.mulf %42, %31 : vector<8x128xf32>
    %105 = arith.mulf %45, %33 : vector<8x128xf32>
    %106 = arith.addf %104, %105 : vector<8x128xf32>
    %107 = arith.mulf %48, %35 : vector<8x128xf32>
    %108 = arith.addf %106, %107 : vector<8x128xf32>
    %cst_59 = arith.constant 0.000000e+00 : f32
    %109 = vector.broadcast %cst_59 : f32 to vector<8x128xf32>
    %110 = arith.maximumf %108, %109 : vector<8x128xf32>
    %c0_60 = arith.constant 0 : index
    %c5_61 = arith.constant 5 : index
    %111 = arith.index_cast %39 : i32 to index
    %c0_62 = arith.constant 0 : index
    %112 = vector.load %arg4[%c0_60, %c5_61, %111, %c0_62] : memref<1x6x8x128xf32, #tpu.memory_space<vmem>>, vector<1x1x8x128xf32>
    %113 = vector.shape_cast %112 : vector<1x1x8x128xf32> to vector<8x128xf32>
    %114 = vector.shape_cast %110 : vector<8x128xf32> to vector<1x1x8x128xf32>
    tpu.vector_store %arg4[%c0_60, %c5_61, %111, %c0_62], %114 {strides = array<i32>} : memref<1x6x8x128xf32, #tpu.memory_space<vmem>>, vector<1x1x8x128xf32>,
    %c1_i32_63 = arith.constant 1 : i32
    return
  }
  func.func @transform_0(%arg0: i32, %arg1: i32) -> (i32, i32) {
    %c0_i32 = arith.constant 0 : i32
    %c0_i32_0 = arith.constant 0 : i32
    %c0_i32_1 = arith.constant 0 : i32
    return %c0_i32, %c0_i32_0 : i32, i32
  }
  func.func @transform_1(%arg0: i32, %arg1: i32) -> (i32, i32, i32, i32) {
    %c0_i32 = arith.constant 0 : i32
    %c0_i32_0 = arith.constant 0 : i32
    %c0_i32_1 = arith.constant 0 : i32
    return %arg0, %c0_i32, %arg1, %c0_i32_0 : i32, i32, i32, i32
  }
  func.func @transform_2(%arg0: i32, %arg1: i32) -> (i32, i32, i32, i32) {
    %c0_i32 = arith.constant 0 : i32
    %c0_i32_0 = arith.constant 0 : i32
    %c0_i32_1 = arith.constant 0 : i32
    return %arg0, %c0_i32, %arg1, %c0_i32_0 : i32, i32, i32, i32
  }
}

</mosaic_0001>

<bundles_post_ra>
// kernel: tpu_custom_call.1
= control target key start
LH: loop header
LB: loop body
LE: loop exit
PB: predicated region body
PF: predicated region fallthrough
CT: control target
= control target key end

     0   :  { %7 = vsyncpa [#allocation5], 0  ;;  %s955_s0 = inlined_call_operand.vmem [shape: f32[6,3], index: 0, kind: input, shape index: {}]   ;;  %s956_s1 = inlined_call_operand.hbm [shape: f32[2,3,8,128], index: 1, kind: input, shape index: {}]   ;;  %s957_s2 = inlined_call_operand.hbm [shape: f32[2,6,8,128], index: 2, kind: output, shape index: {}]  }
   0x1   :  { %8 = vsyncpa [#allocation3], 0 }
   0x2   :  { %10 = vsyncpa [#allocation3 + $0x1], 0 }
   0x3   :  { %11 = vsyncpa [#allocation4], 0 }
   0x4   :  { %13 = vsyncpa [#allocation4 + $0x1], 0  ;;  %s677_s9 = smov 0   ;;  %s679_s10 = smov 0  }
   0x5   :  { %s681_s11 = smov 0   ;;  %s683_s12 = smov 0  }
   0x6   :  { %s685_s13 = smov 0   ;;  %s687_s14 = smov 0  }
   0x7 LB: > { %s405_s15 = sadd.s32 4294967295, %s653_s14   ;;  %s406_s16 = sadd.s32 4294967294, %s653_s14   ;;  %s653_s14 = sphi %s687_s14, %s19_s14   ;;  %s649_s13 = sphi %s685_s13, %s980_s13   ;;  %s645_s12 = sphi %s683_s12, %s979_s12   ;;  %s641_s11 = sphi %s681_s11, %s978_s11   ;;  %s637_s10 = sphi %s679_s10, %s977_s10   ;;  %s633_s9 = sphi %s677_s9, %s976_s9  }
   0x8   : > { %s61_s17 = sadd.s32 1, %s641_s11  ;;  %p68_p0 = scmp.ne.s32.totalorder %s641_s11, %s637_s10 }
   0x9   : > { %p69_p1 = scmp.eq.s32.totalorder %s653_s14, 0  ;;  %p74_p2 = scmp.ne.s32.totalorder %s637_s10, %s633_s9 }
   0xa   : > { %p715_p3 = scmp.eq.s32.totalorder %s405_s15, 0  ;;  %p100_p4 = scmp.eq.s32.totalorder %s405_s15, 1 }
   0xb   : > { %p719_p5 = por %p69_p1, %p68_p0  ;;  %p106_p6 = scmp.eq.s32.totalorder %s406_s16, 1 }
   0xc   : > { %s962_s18 = scalar_select %p715_p3, 1, 0 }
   0xd   : > { %p725_p7 = por %p715_p3, %p74_p2  ;;  %p729_p8 = por %p100_p4, %p68_p0 }
   0xe   : > { %p733_p9 = por %p106_p6, %p74_p2  ;;  %p407_p10 = scmp.ge.s32.totalorder %s653_s14, 1 }
   0xf   : > { %s964_s20 = scalar_select %p725_p7, 1, 0 }
  0x10   : > { %s965_s21 = scalar_select %p729_p8, 1, 0 }
  0x11   : > { %s966_s22 = scalar_select %p733_p9, 1, 0 }
  0x12   : > { %p113_p11 = scmp.lt.s32.totalorder %s653_s14, 3  ;;  %s126_s25 = sshll.u32 %s955_s0, 4  ;;  %s127_s25 = int_to_ptr.vmem [resolvable:$true] %s126_s25 }
  0x13   : > { %p466_p0 = scmp.lt.s32.totalorder %s653_s14, 2  ;;  %s31_s29 = sadd.s32 1, %s649_s13 }
  0x14   : > { %p742_p12 = pnand %p407_p10, %p113_p11  ;;  %p763_p6 = scmp.ge.s32.totalorder %s31_s29, 2 }
  0x15   : > { %p752_p2 = pnand %p466_p0, %p719_p5  ;;  %s137_s3 = sand.u32 1, %s641_s11  }
  0x16   : > { %p453_p1 = pneg %p742_p12  ;;  %s522_s4 = scalar_lea.vmem %s127_s25, 128 }
  0x17   : > { %p523_p10 = scmp.ne.s32.totalorder %s127_s25, %s522_s4  ;;  %p530_p13 = scmp.lt.s32.totalorder %s127_s25, %s127_s25 }
  0x18   : > { %p758_p4 = pnand %p453_p1, %p715_p3  ;;  %p531_p9 = scmp.lt.s32.totalorder %s522_s4, %s522_s4 }
  0x1a   : > { %p524_p11 = pneg %p758_p4  ;;  %p532_p8 = por %p531_p9, %p530_p13 }
  0x1c   : > { %p525_p5 = pnand %p524_p11, %p523_p10 }
  0x1e   : > { %p526_p0 = pneg %p525_p5 }
  0x20   : > { %p533_p1 = pnand %p532_p8, %p526_p0 }
  0x22   : > { %536 = shalt.err (!%p533_p1)
}
  0x23   : > { %s655_s5 = smov [#allocation2]   ;;  %s982_s29 = smov (%p763_p6, %s31_s29), 0 }
  0x24   : > { %456 = dma.vmem_to_smem (!%p758_p4), %s127_s25, 128, %s655_s5, [#allocation5]  }
  0x25   : > { %s440_s6 = smul.u32 24, %s137_s3  ;;  %s56_s7 = ssub.s32 %s649_s13, %s982_s29 }
  0x26   : > { %s441_s8 = smul.u32 384, %s649_s13  ;;  %p59_p8 = scmp.eq.s32.totalorder %s56_s7, 0 }
  0x27   : > { %s141_s23 = scalar_lea.vmem [#allocation6], %s440_s6  ;;  %s791_s28 = scalar_lea.sflag [#allocation3], %s137_s3 }
  0x28   : > { %s782_s19 = scalar_lea.hbm %s956_s1, %s441_s8  ;;  %s149_s24 = sshll.u32 %s141_s23, 4  ;;  %s789_s24 = int_to_ptr.vmem [resolvable:$true] %s149_s24 }
  0x29   : > { %s787_s25 = scalar_select %p59_p8, %s641_s11, %s61_s17  }
  0x2a   : > { %s537_s30 = scalar_lea.hbm %s782_s19, 384  ;;  %p539_p13 = pneg %p752_p2 }
  0x2b   : > { %p538_p9 = scmp.ne.s32.totalorder %s782_s19, %s537_s30  ;;  %s542_s6 = scalar_lea.hbm %s956_s1, 768 }
  0x2c   : > { %p543_p10 = scmp.lt.u32.totalorder %s782_s19, %s956_s1  ;;  %p544_p11 = scmp.lt.u32.totalorder %s542_s6, %s537_s30 }
  0x2d   : > { %p540_p4 = pnand %p539_p13, %p538_p9  ;;  %p546_p0 = scmp.lt.u32.totalorder %s537_s30, %s782_s19 }
  0x2e   : > { %p545_p5 = por %p544_p11, %p543_p10 }
  0x2f   : > { %p541_p6 = pneg %p540_p4 }
  0x30   : > { %p547_p1 = por %p546_p0, %p545_p5 }
  0x32   : > { %p548_p8 = pnand %p547_p1, %p541_p6 }
  0x34   : > { %551 = shalt.err (!%p548_p8)
}
  0x35   : > { %s552_s17 = scalar_lea.vmem %s789_s24, 384  ;;  %s656_s3 = smov [#allocation6]  }
  0x36   : > { %p553_p9 = scmp.ne.s32.totalorder %s789_s24, %s552_s17  ;;  %s557_s15 = sshll.u32 %s656_s3, 4  ;;  %s558_s15 = int_to_ptr.vmem [resolvable:$false] %s557_s15 }
  0x37   : > { %s559_s16 = scalar_lea.vmem %s558_s15, 768  ;;  %p560_p3 = scmp.lt.s32.totalorder %s789_s24, %s558_s15 }
  0x38   : > { %p555_p4 = pnand %p553_p9, %p539_p13  ;;  %p561_p10 = scmp.lt.s32.totalorder %s559_s16, %s552_s17 }
  0x3a   : > { %p556_p7 = pneg %p555_p4  ;;  %p562_p11 = por %p561_p10, %p560_p3 }
  0x3c   : > { %p563_p5 = pnand %p562_p11, %p556_p7 }
  0x3e   : > { %566 = shalt.err (!%p563_p5)
}
  0x3f   : > { %s657_s23 = smov 128   ;;  %s658_s30 = smov 8  }
  0x40   : > { %460 = dma.hbm_to_vmem [thread:$0]  (!%p752_p2), %s782_s19, 384, %s789_s24, %s791_s28, %s657_s23, %s657_s23, %s658_s30  }
  0x41   : > { %161 = sbr.rel (%p742_p12) target bundleno = 121 (0x79), region = 28  ;;  %p971_p13 = scmp.ne.s32.totalorder (!%p742_p12), %s962_s18, 0 }
  0x48   : > { %620 = dma.done.wait (%p971_p13), [#allocation5], 128  }
  0x49   : > { %622 = vsyncadd (%p971_p13), [#allocation5], 4294967168  ;;  %s826_s4 = sand.u32 1, %s637_s10   ;;  %p972_p3 = scmp.ne.s32.totalorder %s964_s20, 0 }
  0x4a   : > { %s442_s5 = smul.u32 24, %s826_s4  ;;  %s168_s6 = scalar_lea.sflag [#allocation3], %s826_s4 }
  0x4c   : > { %s171_s7 = scalar_lea.vmem [#allocation6], %s442_s5 }
  0x4d   : > { %624 = dma.done.wait (%p972_p3), %s168_s6, 384  }
  0x4e   : > { %626 = vsyncadd (%p972_p3), %s168_s6, 4294966912 }
  0x4f   : > { %176 = sfence }
  0x50   : > { %s193_s26 = sld [smem:[#allocation2]]  ;;  %s413_s27 = sld [smem:[#allocation2 + $0x1]]  ;;  %v835_v0 = vld [vmem:[%s171_s7] sm:$0xff]  ;;  %v837_v1 = vld [vmem:[%s171_s7 + $0x8] sm:$0xff]  ;;  %v839_v2 = vld [vmem:[%s171_s7 + $0x10] sm:$0xff] }
  0x51   : > { %s414_s18 = sld [smem:[#allocation2 + $0x2]]  ;;  %s415_s19 = sld [smem:[#allocation2 + $0x80]] }
  0x52   : > { %s416_s24 = sld [smem:[#allocation2 + $0x81]]  ;;  %s443_s28 = smul.u32 48, %s826_s4 }
  0x53   : > { %s417_s8 = sld [smem:[#allocation2 + $0x82]]  ;;  %s841_s17 = sld [smem:[#allocation2 + $0x100]] }
  0x54   : > { %s419_s3 = sld [smem:[#allocation2 + $0x101]]  ;;  %s420_s20 = sld [smem:[#allocation2 + $0x102]] }
  0x55   : > { %s843_s15 = sld [smem:[#allocation2 + $0x180]]  ;;  %s846_s16 = sld [smem:[#allocation2 + $0x181]] }
  0x56   : > { %v194_v3 = vstv %s193_s26  ;;  %v196_v4 = vstv %s413_s27  ;;  %s848_s23 = sld [smem:[#allocation2 + $0x182]]  ;;  %s852_s30 = sld [smem:[#allocation2 + $0x200]] }
  0x57   : > { %v198_v5 = vstv %s414_s18  ;;  %v236_v6 = vmul.f32 %v835_v0, %v194_v3  ;;  %v237_v7 = vmul.f32 %v837_v1, %v196_v4  ;;  %v200_v9 = vstv %s415_s19  ;;  %s854_s5 = sld [smem:[#allocation2 + $0x201]]  ;;  %s857_s6 = sld [smem:[#allocation2 + $0x202]] }
  0x58   : > { %v239_v8 = vmul.f32 %v839_v2, %v198_v5  ;;  %v202_v10 = vstv %s416_s24  ;;  %v243_v11 = vmul.f32 %v835_v0, %v200_v9  ;;  %s859_s7 = sld [smem:[#allocation2 + $0x280]]  ;;  %s862_s26 = sld [smem:[#allocation2 + $0x281]] }
  0x59   : > { %v238_v12 = vadd.f32 %v237_v7, %v236_v6  ;;  %v204_v13 = vstv %s417_s8  ;;  %v244_v14 = vmul.f32 %v837_v1, %v202_v10  ;;  %s864_s27 = sld [smem:[#allocation2 + $0x282]]  ;;  %v206_v16 = vstv %s841_s17  ;;  %s880_s18 = scalar_lea.vmem [#allocation7], %s443_s28 }
  0x5a   : > { %v246_v15 = vmul.f32 %v839_v2, %v204_v13  ;;  %v208_v17 = vstv %s419_s3  ;;  %v210_v20 = vstv %s420_s20  ;;  %v251_v21 = vmul.f32 %v835_v0, %v206_v16  ;;  %s301_s19 = sshll.u32 %s880_s18, 4  ;;  %s444_s24 = smul.u32 768, %s645_s12  ;;  %s899_s19 = int_to_ptr.vmem [resolvable:$true] %s301_s19 }
  0x5b   : > { %v240_v18 = vadd.f32 %v239_v8, %v238_v12  ;;  %v245_v19 = vadd.f32 %v244_v14, %v243_v11  ;;  %v252_v22 = vmul.f32 %v837_v1, %v208_v17  ;;  %v254_v23 = vmul.f32 %v839_v2, %v210_v20  ;;  %s287_s3 = scalar_lea.sflag [#allocation4], %s826_s4  ;;  %s567_s20 = scalar_lea.vmem %s899_s19, 768 }
  0x5c   : > { %v212_v24 = vstv %s843_s15  ;;  %v214_v25 = vstv %s846_s16  ;;  %v216_v28 = vstv %s848_s23  ;;  %v218_v33 = vstv %s852_s30  ;;  %s905_s17 = scalar_lea.hbm %s957_s2, %s444_s24  ;;  %p568_p7 = scmp.ne.s32.totalorder %s899_s19, %s567_s20 }
  0x5d   : > { %v241_v26 = vmax.f32 %v240_v18, 0.0  ;;  %v247_v27 = vadd.f32 %v246_v15, %v245_v19  ;;  %v259_v29 = vmul.f32 %v835_v0, %v212_v24  ;;  %v253_v30 = vadd.f32 %v252_v22, %v251_v21  ;;  %p973_p12 = scmp.ne.s32.totalorder %s965_s21, 0  ;;  %s659_s12 = smov [#allocation7]  }
  0x5e   : > { %v260_v31 = vmul.f32 %v837_v1, %v214_v25  ;;  %v262_v32 = vmul.f32 %v839_v2, %v216_v28  ;;  %v220_v35 = vstv %s854_s5  ;;  %v222_v36 = vstv %s857_s6  ;;  %s571_s15 = sshll.u32 %s659_s12, 4  ;;  %s572_s15 = int_to_ptr.vmem [resolvable:$false] %s571_s15 }
  0x5f   : > { %242 = vst [vmem:[%s880_s18] sm:$0xff] %v241_v26  ;;  %v248_v34 = vmax.f32 %v247_v27, 0.0  ;;  %v268_v37 = vmul.f32 %v835_v0, %v218_v33  ;;  %v255_v38 = vadd.f32 %v254_v23, %v253_v30  ;;  %v269_v40 = vmul.f32 %v837_v1, %v220_v35  ;;  %p569_p2 = pnand %p568_p7, %p973_p12  ;;  %s573_s16 = scalar_lea.vmem %s572_s15, 1536 }
  0x60   : > { %v261_v39 = vadd.f32 %v260_v31, %v259_v29  ;;  %v271_v41 = vmul.f32 %v839_v2, %v222_v36  ;;  %v224_v42 = vstv %s859_s7  ;;  %v226_v43 = vstv %s862_s26  ;;  %p574_p0 = scmp.lt.s32.totalorder %s899_s19, %s572_s15  ;;  %p575_p1 = scmp.lt.s32.totalorder %s573_s16, %s567_s20 }
  0x61   : > { %432 = vst [vmem:[%s880_s18 + $0x8] sm:$0xff] %v248_v34  ;;  %v228_v44 = vstv %s864_s27  ;;  %v256_v45 = vmax.f32 %v255_v38, 0.0  ;;  %v270_v47 = vadd.f32 %v269_v40, %v268_v37  ;;  %v277_v48 = vmul.f32 %v835_v0, %v224_v42  ;;  %p570_p6 = pneg %p569_p2 }
  0x62   : > { %v263_v46 = vadd.f32 %v262_v32, %v261_v39  ;;  %v278_v49 = vmul.f32 %v837_v1, %v226_v43  ;;  %v280_v50 = vmul.f32 %v839_v2, %v228_v44  ;;  %p576_p8 = por %p575_p1, %p574_p0 }
  0x63   : > { %433 = vst [vmem:[%s880_s18 + $0x10] sm:$0xff] %v256_v45  ;;  %v272_v52 = vadd.f32 %v271_v41, %v270_v47 }
  0x64   : > { %v264_v51 = vmax.f32 %v263_v46, 0.0  ;;  %v279_v53 = vadd.f32 %v278_v49, %v277_v48  ;;  %p577_p9 = pnand %p576_p8, %p570_p6 }
  0x65   : > { %v273_v54 = vmax.f32 %v272_v52, 0.0 }
  0x66   : > { %434 = vst [vmem:[%s880_s18 + $0x18] sm:$0xff] %v264_v51  ;;  %v281_v55 = vadd.f32 %v280_v50, %v279_v53 }
  0x67   : > { %435 = vst [vmem:[%s880_s18 + $0x20] sm:$0xff] %v273_v54 }
  0x68   : > { %v282_v56 = vmax.f32 %v281_v55, 0.0 }
  0x6a   : > { %436 = vst [vmem:[%s880_s18 + $0x28] sm:$0xff] %v282_v56 }
  0x6b   : > { %580 = shalt.err (!%p577_p9)
}
  0x6c   : > { %s581_s23 = scalar_lea.hbm %s905_s17, 768  ;;  %s585_s6 = scalar_lea.hbm %s957_s2, 1536 }
  0x6d   : > { %p582_p4 = scmp.ne.s32.totalorder %s905_s17, %s581_s23  ;;  %p586_p5 = scmp.lt.u32.totalorder %s905_s17, %s957_s2 }
  0x6e   : > { %p587_p13 = scmp.lt.u32.totalorder %s585_s6, %s581_s23  ;;  %p589_p7 = scmp.lt.u32.totalorder %s581_s23, %s905_s17 }
  0x6f   : > { %p583_p10 = pnand %p582_p4, %p973_p12 }
  0x70   : > { %p588_p3 = por %p587_p13, %p586_p5 }
  0x71   : > { %p584_p11 = pneg %p583_p10 }
  0x72   : > { %p590_p2 = por %p589_p7, %p588_p3 }
  0x74   : > { %p591_p6 = pnand %p590_p2, %p584_p11 }
  0x76   : > { %594 = shalt.err (!%p591_p6)
}
  0x77   : > { %s660_s27 = smov 128   ;;  %s661_s18 = smov 8  }
  0x78   : > { %451 = dma.vmem_to_hbm [thread:$0]  (%p973_p12), %s899_s19, 768, %s905_s17, %s287_s3, %s660_s27, %s660_s27, %s661_s18  }
  0x79 PF: > { %s316_s24 = sand.u32 1, %s633_s9   ;;  %p974_p0 = scmp.ne.s32.totalorder %s966_s22, 0 }
  0x7a   : > { %p975_p1 = scmp.ge.s32.totalorder %s653_s14, 2  ;;  %s317_s28 = scalar_lea.sflag [#allocation4], %s316_s24 }
  0x7c   : > { %p462_p8 = pnand %p975_p1, %p974_p0 }
  0x7e   : > { %628 = dma.done.wait (!%p462_p8), %s317_s28, 768  }
  0x7f   : > { %630 = vsyncadd (!%p462_p8), %s317_s28, 4294966528  ;;  %s19_s14 = sadd.s32 1, %s653_s14   ;;  %s976_s9 = smov %s637_s10 }
  0x80   : > { %p16_p9 = scmp.ge.s32.totalorder %s19_s14, 4   ;;  %s977_s10 = smov %s641_s11 }
  0x81   : > { %s978_s11 = smov %s787_s25  ;;  %s979_s12 = smov %s649_s13 }
  0x82   : > { %s980_s13 = smov %s982_s29  ;;  %18 = sbr.rel (!%p16_p9) target bundleno = 7 (0x7), region = 85 }
  0x89   :  { %322 = vsyncpa [#allocation3], 1 }
  0x8a   :  { %324 = vsyncpa [#allocation3 + $0x1], 1 }
  0x8b   :  { %325 = vsyncpa [#allocation4], 1 }
  0x8c   :  { %327 = vsyncpa [#allocation4 + $0x1], 1 }
  0x8d   :  { %328 = vsyncpa [#allocation5], 1 }
  0x8e   :  { %330 = vsyncpa [#allocation5 + $0x1], 1 }

</bundles_post_ra>
